<compile_context>
chip_gen: v6e
topology: v6e:2x2x1
jax: 0.10.0
libtpu: 0.0.40
codegen_flags: <defaults>
</compile_context>

<pallas_src>
import jax
import jax.numpy as jnp
from jax.experimental import pallas as pl
from jax.experimental.pallas import tpu as pltpu


# ----------------------------- Pallas kernel ------------------------------ #
def _attention_block_kernel(
    gate_ref,   # (F_g, T)   tile of the gating signal (one batch element)
    skip_ref,   # (F_l, T)   tile of the skip connection
    wg_ref,     # (n_c, F_g) folded W_gate conv weight (resident)
    wx_ref,     # (n_c, F_l) folded W_x conv weight (resident)
    bgx_ref,    # (n_c, 1)   folded bias of W_gate + W_x (resident)
    wp_ref,     # (n_c, 1)   folded psi conv weight, stored as a column (resident)
    bp_ref,     # (1, 1)     folded psi bias (scalar, SMEM)
    out_ref,    # (F_l, T)   out = skip * sigmoid(psi)
):
    gate = gate_ref[...].astype(jnp.float32)   # (F_g, T)
    skip = skip_ref[...].astype(jnp.float32)   # (F_l, T)

    # g1 + x1 = BN(Conv1x1(gate)) + BN(Conv1x1(skip))   (BN folded into W, b;
    # the two biases are pre-summed into bgx so there is a single broadcast add)
    z = jnp.dot(wg_ref[...], gate, preferred_element_type=jnp.float32)
    z = z + jnp.dot(wx_ref[...], skip, preferred_element_type=jnp.float32)
    act = jnp.maximum(z + bgx_ref[...], 0.0)   # ReLU, (n_c, T)

    # psi = Sigmoid(BN(Conv1x1(act)))  -> (1, T).  The 1-output-channel conv is
    # a sublane reduce (XLU), cheaper than a degenerate MXU push.
    p = jnp.sum(act * wp_ref[...], axis=0, keepdims=True) + bp_ref[0, 0]
    p = pl.reciprocal(1.0 + jnp.exp(-p), approx=False)   # exact sigmoid

    # out = skip_connection * psi  (broadcast over channels; lane-dense store)
    out_ref[...] = (skip * p).astype(out_ref.dtype)


# ------------------------------ Host wrapper ------------------------------ #
def attention_block_pallas(gate_nchw, skip_nchw, params, *, max_tile_p=2048):
    """gate_nchw: (N, F_g, H, W), skip_nchw: (N, F_l, H, W) -> (N, F_l, H, W)."""
    N, F_g, H, W = gate_nchw.shape
    _, F_l, _, _ = skip_nchw.shape
    n_c = params["wg"].shape[0]
    P = H * W

    # Free reshapes: NCHW memory order already has pixels contiguous per channel.
    gate3 = gate_nchw.reshape(N, F_g, P)
    skip3 = skip_nchw.reshape(N, F_l, P)

    # Pixel-axis tile: big (amortize per-step overhead), lane-dense (x128).
    # Ragged tail handled by pl.cdiv (Pallas clips the edge block's stores).
    if P % 128 == 0:
        tile_p = min(P, max_tile_p)
    else:
        tile_p = P  # full-extent last dim satisfies the (8,128) constraint
    grid = (N, pl.cdiv(P, tile_p))

    out3 = pl.pallas_call(
        _attention_block_kernel,
        out_shape=jax.ShapeDtypeStruct((N, F_l, P), skip_nchw.dtype),
        grid_spec=pltpu.PrefetchScalarGridSpec(
            num_scalar_prefetch=0,
            grid=grid,
            in_specs=[
                pl.BlockSpec((None, F_g, tile_p), lambda n, j: (n, 0, j)),  # gate
                pl.BlockSpec((None, F_l, tile_p), lambda n, j: (n, 0, j)),  # skip
                pl.BlockSpec((n_c, F_g), lambda n, j: (0, 0)),              # wg
                pl.BlockSpec((n_c, F_l), lambda n, j: (0, 0)),              # wx
                pl.BlockSpec((n_c, 1), lambda n, j: (0, 0)),                # bgx
                pl.BlockSpec((n_c, 1), lambda n, j: (0, 0)),                # wp
                pl.BlockSpec(memory_space=pltpu.MemorySpace.SMEM),          # bp
            ],
            out_specs=pl.BlockSpec((None, F_l, tile_p), lambda n, j: (n, 0, j)),
        ),
        compiler_params=pltpu.CompilerParams(
            dimension_semantics=("parallel", "parallel"),
        ),
    )(
        gate3, skip3,
        params["wg"], params["wx"], params["bgx"], params["wp"], params["bp"],
    )

    return out3.reshape(N, F_l, H, W)


# ----------------------- Deterministic parameter setup --------------------- #
def _fold_bn(conv_w, conv_b, gamma, beta, mean, var, eps=1e-5):
    """Fold eval-mode BatchNorm into a 1x1 conv stored as (Cout, Cin)."""
    scale = gamma / jnp.sqrt(var + eps)              # (Cout,)
    w_eff = conv_w * scale[:, None]                  # (Cout, Cin)
    b_eff = (conv_b - mean) * scale + beta           # (Cout,)
    return w_eff, b_eff


def make_params(F_g, F_l, n_c, key):
    ks = jax.random.split(key, 12)
    dt = jnp.float32

    # Conv weights stored as (Cout, Cin) so conv1x1 == W @ x (channels-first).
    wg = jax.random.normal(ks[0], (n_c, F_g), dt) * 0.1
    bg = jax.random.normal(ks[1], (n_c,), dt) * 0.1
    wx = jax.random.normal(ks[2], (n_c, F_l), dt) * 0.1
    bx = jax.random.normal(ks[3], (n_c,), dt) * 0.1
    wp = jax.random.normal(ks[4], (1, n_c), dt) * 0.1
    bp = jax.random.normal(ks[5], (1,), dt) * 0.1

    # Eval-mode BatchNorm parameters (deterministic, non-trivial).
    def bn(kg, kb, c):
        gamma = 1.0 + 0.1 * jax.random.normal(kg, (c,), dt)
        beta = 0.1 * jax.random.normal(kb, (c,), dt)
        mean = 0.05 * jnp.arange(c, dtype=dt)
        var = 1.0 + 0.02 * jnp.arange(c, dtype=dt)
        return gamma, beta, mean, var

    wg_e, bg_e = _fold_bn(wg, bg, *bn(ks[6], ks[7], n_c))
    wx_e, bx_e = _fold_bn(wx, bx, *bn(ks[8], ks[9], n_c))
    wp_e, bp_e = _fold_bn(wp, bp, *bn(ks[10], ks[11], 1))

    return {
        "wg": wg_e,                          # (n_c, F_g)
        "wx": wx_e,                          # (n_c, F_l)
        "bgx": (bg_e + bx_e)[:, None],       # (n_c, 1)  fused bg + bx
        "wp": jnp.transpose(wp_e),           # (n_c, 1)  psi weight as a column
        "bp": bp_e.reshape(1, 1),            # (1, 1)    psi bias (SMEM scalar)
    }


# -------------------------- Plain-JAX reference ---------------------------- #
def attention_block_ref(gate_nchw, skip_nchw, params):
    N, F_g, H, W = gate_nchw.shape
    F_l = skip_nchw.shape[1]
    g3 = gate_nchw.reshape(N, F_g, H * W).astype(jnp.float32)
    s3 = skip_nchw.reshape(N, F_l, H * W).astype(jnp.float32)
    z = jnp.einsum("cf,nfp->ncp", params["wg"], g3)
    z = z + jnp.einsum("cf,nfp->ncp", params["wx"], s3)
    act = jnp.maximum(z + params["bgx"][None], 0.0)
    p = jnp.sum(act * params["wp"][None], axis=1, keepdims=True) + params["bp"][0, 0]
    p = jax.nn.sigmoid(p)
    out = s3 * p
    return out.reshape(N, F_l, H, W).astype(skip_nchw.dtype)


# ---------------------------------- Main ----------------------------------- #
if __name__ == "__main__":
    key = jax.random.PRNGKey(0)
    k_g, k_s, k_p = jax.random.split(key, 3)

    N, F_g, F_l, n_coefficients, Hs, Ws = 2, 4, 4, 8, 16, 16

    gate = jax.random.normal(k_g, (N, F_g, Hs, Ws), jnp.float32)
    skip = jax.random.normal(k_s, (N, F_l, Hs, Ws), jnp.float32)
    params = make_params(F_g, F_l, n_coefficients, k_p)

    out = attention_block_pallas(gate, skip, params)
    out = jax.block_until_ready(out)

    ref = attention_block_ref(gate, skip, params)
    assert out.shape == (N, F_l, Hs, Ws)
    assert jnp.max(jnp.abs(out - ref)) < 1e-4

    print("KERNEL_OK")
</pallas_src>

<mosaic_0001>
module attributes {stable_mosaic.version = 11 : i64} {
  func.func @_attention_block_kernel(%arg0: i32, %arg1: i32, %arg2: memref<1x4x256xf32, #tpu.memory_space<vmem>>, %arg3: memref<1x4x256xf32, #tpu.memory_space<vmem>>, %arg4: memref<8x4xf32, #tpu.memory_space<vmem>>, %arg5: memref<8x4xf32, #tpu.memory_space<vmem>>, %arg6: memref<8x1xf32, #tpu.memory_space<vmem>>, %arg7: memref<8x1xf32, #tpu.memory_space<vmem>>, %arg8: memref<1x1xf32, #tpu.memory_space<smem>>, %arg9: memref<1x4x256xf32, #tpu.memory_space<vmem>>) attributes {dimension_semantics = [#tpu.dimension_semantics<parallel>, #tpu.dimension_semantics<parallel>], iteration_bounds = array<i64: 2, 1>, scalar_prefetch = 0 : i64, scratch_operands = 0 : i64, tpu.core_type = #tpu.core_type<tc>, window_params = [{transform_indices = @transform_0, window_bounds = array<i64: 1, 4, 256>}, {transform_indices = @transform_1, window_bounds = array<i64: 1, 4, 256>}, {pipeline_mode = #tpu.pipeline_mode<synchronous>, transform_indices = @transform_2, window_bounds = array<i64: 8, 4>}, {pipeline_mode = #tpu.pipeline_mode<synchronous>, transform_indices = @transform_3, window_bounds = array<i64: 8, 4>}, {pipeline_mode = #tpu.pipeline_mode<synchronous>, transform_indices = @transform_4, window_bounds = array<i64: 8, 1>}, {pipeline_mode = #tpu.pipeline_mode<synchronous>, transform_indices = @transform_5, window_bounds = array<i64: 8, 1>}, {transform_indices = @transform_6, window_bounds = array<i64: 1, 1>}, {transform_indices = @transform_7, window_bounds = array<i64: 1, 4, 256>}]} {
    %c0 = arith.constant 0 : index
    %c0_0 = arith.constant 0 : index
    %c0_1 = arith.constant 0 : index
    %0 = vector.load %arg2[%c0, %c0_0, %c0_1] : memref<1x4x256xf32, #tpu.memory_space<vmem>>, vector<1x4x256xf32>
    %1 = vector.shape_cast %0 : vector<1x4x256xf32> to vector<4x256xf32>
    %c0_2 = arith.constant 0 : index
    %c0_3 = arith.constant 0 : index
    %c0_4 = arith.constant 0 : index
    %2 = vector.load %arg3[%c0_2, %c0_3, %c0_4] : memref<1x4x256xf32, #tpu.memory_space<vmem>>, vector<1x4x256xf32>
    %3 = vector.shape_cast %2 : vector<1x4x256xf32> to vector<4x256xf32>
    %c0_5 = arith.constant 0 : index
    %c0_6 = arith.constant 0 : index
    %4 = vector.load %arg4[%c0_5, %c0_6] : memref<8x4xf32, #tpu.memory_space<vmem>>, vector<8x4xf32>
    %cst = arith.constant dense<0.000000e+00> : vector<8x256xf32>
    %5 = tpu.matmul %4, %1, %cst {dimension_numbers = #tpu.dot_dimension_numbers<[1], [0], [0], [1], [0, 0, 1, 1], [], []>} : vector<8x4xf32>, vector<4x256xf32>, vector<8x256xf32> -> vector<8x256xf32>
    %c0_7 = arith.constant 0 : index
    %c0_8 = arith.constant 0 : index
    %6 = vector.load %arg5[%c0_7, %c0_8] : memref<8x4xf32, #tpu.memory_space<vmem>>, vector<8x4xf32>
    %cst_9 = arith.constant dense<0.000000e+00> : vector<8x256xf32>
    %7 = tpu.matmul %6, %3, %cst_9 {dimension_numbers = #tpu.dot_dimension_numbers<[1], [0], [0], [1], [0, 0, 1, 1], [], []>} : vector<8x4xf32>, vector<4x256xf32>, vector<8x256xf32> -> vector<8x256xf32>
    %8 = arith.addf %5, %7 : vector<8x256xf32>
    %c0_10 = arith.constant 0 : index
    %c0_11 = arith.constant 0 : index
    %9 = vector.load %arg6[%c0_10, %c0_11] : memref<8x1xf32, #tpu.memory_space<vmem>>, vector<8x1xf32>
    %10 = vector.broadcast %9 : vector<8x1xf32> to vector<8x256xf32>
    %11 = arith.addf %8, %10 : vector<8x256xf32>
    %cst_12 = arith.constant 0.000000e+00 : f32
    %12 = vector.broadcast %cst_12 : f32 to vector<8x256xf32>
    %13 = arith.maximumf %11, %12 : vector<8x256xf32>
    %c0_13 = arith.constant 0 : index
    %c0_14 = arith.constant 0 : index
    %14 = vector.load %arg7[%c0_13, %c0_14] : memref<8x1xf32, #tpu.memory_space<vmem>>, vector<8x1xf32>
    %15 = vector.broadcast %14 : vector<8x1xf32> to vector<8x256xf32>
    %16 = arith.mulf %13, %15 : vector<8x256xf32>
    %cst_15 = arith.constant dense<0.000000e+00> : vector<256xf32>
    %17 = vector.multi_reduction <add>, %16, %cst_15 [0] : vector<8x256xf32> to vector<256xf32>
    %18 = vector.shape_cast %17 : vector<256xf32> to vector<1x256xf32>
    %c0_16 = arith.constant 0 : index
    %c0_17 = arith.constant 0 : index
    %19 = memref.load %arg8[%c0_16, %c0_17] : memref<1x1xf32, #tpu.memory_space<smem>>
    %20 = vector.broadcast %19 : f32 to vector<1x256xf32>
    %21 = arith.addf %18, %20 : vector<1x256xf32>
    %cst_18 = arith.constant 0.000000e+00 : f32
    %22 = vector.broadcast %cst_18 : f32 to vector<1x256xf32>
    %23 = arith.subf %22, %21 : vector<1x256xf32>
    %24 = math.exp %23 : vector<1x256xf32>
    %cst_19 = arith.constant 1.000000e+00 : f32
    %25 = vector.broadcast %cst_19 : f32 to vector<1x256xf32>
    %26 = arith.addf %25, %24 : vector<1x256xf32>
    %27 = tpu.reciprocal %26 : vector<1x256xf32> -> vector<1x256xf32>
    %28 = vector.broadcast %27 : vector<1x256xf32> to vector<4x256xf32>
    %29 = arith.mulf %3, %28 : vector<4x256xf32>
    %c0_20 = arith.constant 0 : index
    %c0_21 = arith.constant 0 : index
    %c0_22 = arith.constant 0 : index
    %30 = vector.load %arg9[%c0_20, %c0_21, %c0_22] : memref<1x4x256xf32, #tpu.memory_space<vmem>>, vector<1x4x256xf32>
    %31 = vector.shape_cast %30 : vector<1x4x256xf32> to vector<4x256xf32>
    %32 = vector.shape_cast %29 : vector<4x256xf32> to vector<1x4x256xf32>
    tpu.vector_store %arg9[%c0_20, %c0_21, %c0_22], %32 {strides = array<i32>} : memref<1x4x256xf32, #tpu.memory_space<vmem>>, vector<1x4x256xf32>,
    return
  }
  func.func @transform_0(%arg0: i32, %arg1: i32) -> (i32, i32, i32) {
    %c0_i32 = arith.constant 0 : i32
    %c0_i32_0 = arith.constant 0 : i32
    return %arg0, %c0_i32, %arg1 : i32, i32, i32
  }
  func.func @transform_1(%arg0: i32, %arg1: i32) -> (i32, i32, i32) {
    %c0_i32 = arith.constant 0 : i32
    %c0_i32_0 = arith.constant 0 : i32
    return %arg0, %c0_i32, %arg1 : i32, i32, i32
  }
  func.func @transform_2(%arg0: i32, %arg1: i32) -> (i32, i32) {
    %c0_i32 = arith.constant 0 : i32
    %c0_i32_0 = arith.constant 0 : i32
    %c0_i32_1 = arith.constant 0 : i32
    return %c0_i32, %c0_i32_0 : i32, i32
  }
  func.func @transform_3(%arg0: i32, %arg1: i32) -> (i32, i32) {
    %c0_i32 = arith.constant 0 : i32
    %c0_i32_0 = arith.constant 0 : i32
    %c0_i32_1 = arith.constant 0 : i32
    return %c0_i32, %c0_i32_0 : i32, i32
  }
  func.func @transform_4(%arg0: i32, %arg1: i32) -> (i32, i32) {
    %c0_i32 = arith.constant 0 : i32
    %c0_i32_0 = arith.constant 0 : i32
    %c0_i32_1 = arith.constant 0 : i32
    return %c0_i32, %c0_i32_0 : i32, i32
  }
  func.func @transform_5(%arg0: i32, %arg1: i32) -> (i32, i32) {
    %c0_i32 = arith.constant 0 : i32
    %c0_i32_0 = arith.constant 0 : i32
    %c0_i32_1 = arith.constant 0 : i32
    return %c0_i32, %c0_i32_0 : i32, i32
  }
  func.func @transform_6(%arg0: i32, %arg1: i32) -> (i32, i32) {
    %c0_i32 = arith.constant 0 : i32
    %c0_i32_0 = arith.constant 0 : i32
    %c0_i32_1 = arith.constant 0 : i32
    return %c0_i32, %c0_i32_0 : i32, i32
  }
  func.func @transform_7(%arg0: i32, %arg1: i32) -> (i32, i32, i32) {
    %c0_i32 = arith.constant 0 : i32
    %c0_i32_0 = arith.constant 0 : i32
    return %arg0, %c0_i32, %arg1 : i32, i32, i32
  }
}

</mosaic_0001>

<bundles_post_ra>
// kernel: tpu_custom_call.1
= control target key start
LH: loop header
LB: loop body
LE: loop exit
PB: predicated region body
PF: predicated region fallthrough
CT: control target
= control target key end

     0   :  { %s1008_s0 = inlined_call_operand.vmem [shape: f32[2,4,256], index: 0, kind: input, shape index: {}]   ;;  %s1009_s1 = inlined_call_operand.vmem [shape: f32[2,4,256], index: 1, kind: input, shape index: {}]   ;;  %s1010_s2 = inlined_call_operand.vmem [shape: f32[8,4], index: 2, kind: input, shape index: {}]   ;;  %s1011_s3 = inlined_call_operand.vmem [shape: f32[8,4], index: 3, kind: input, shape index: {}]   ;;  %s1012_s4 = inlined_call_operand.vmem [shape: f32[8,1], index: 4, kind: input, shape index: {}]   ;;  %s1013_s5 = inlined_call_operand.vmem [shape: f32[8,1], index: 5, kind: input, shape index: {}]   ;;  %s1014_s6 = inlined_call_operand.<no memory space> [shape: f32[1,1], index: 6, kind: input, shape index: {}]   ;;  %s1015_s7 = inlined_call_operand.hbm [shape: f32[2,4,256], index: 7, kind: output, shape index: {}]  }
   0x1   :  { %12 = sst [smem:[#allocation2]] %s1014_s6 }
   0x2   :  { %13 = vsyncpa [#allocation4], 0 }
   0x3   :  { %15 = vsyncpa [#allocation4 + $0x1], 0  ;;  %s888_s26 = smov 0   ;;  %s890_s27 = smov 0  }
   0x4   :  { %s892_s28 = smov 0   ;;  %s894_s29 = smov 0  }
   0x5   :  { %s896_s30 = smov 0   ;;  %s898_s8 = smov 0  }
   0x6 LB: > { %s672_s6 = sadd.s32 4294967295, %s840_s8   ;;  %s673_s9 = sadd.s32 4294967294, %s840_s8   ;;  %s840_s8 = sphi %s898_s8, %s21_s8   ;;  %s836_s30 = sphi %s896_s30, %s1022_s30   ;;  %s832_s29 = sphi %s894_s29, %s1021_s29   ;;  %s828_s28 = sphi %s892_s28, %s1020_s28   ;;  %s824_s27 = sphi %s890_s27, %s1019_s27   ;;  %s820_s26 = sphi %s888_s26, %s1018_s26  }
   0x7   : > { %s33_s10 = sadd.s32 1, %s836_s30  ;;  %s203_s11 = sadd.s32 1, %s828_s28 }
   0x8   : > { %p35_p0 = scmp.ge.s32.totalorder %s33_s10, 2  ;;  %p213_p1 = scmp.ne.s32.totalorder %s828_s28, %s824_s27 }
   0x9   : > { %p214_p2 = scmp.eq.s32.totalorder %s672_s6, 1  ;;  %p219_p3 = scmp.ne.s32.totalorder %s824_s27, %s820_s26 }
   0xa   : > { %s1024_s10 = smov (%p35_p0, %s33_s10), 0  ;;  %p220_p5 = scmp.eq.s32.totalorder %s673_s9, 1 }
   0xb   : > { %p928_p4 = por %p214_p2, %p213_p1  ;;  %s198_s13 = ssub.s32 %s836_s30, %s1024_s10 }
   0xc   : > { %p676_p6 = scmp.ge.s32.totalorder %s840_s8, 1  ;;  %p201_p7 = scmp.eq.s32.totalorder %s198_s13, 0 }
   0xd   : > { %p935_p8 = por %p220_p5, %p219_p3  ;;  %p279_p9 = scmp.lt.s32.totalorder %s840_s8, 3 }
   0xe   : > { %s941_s15 = scalar_select %p201_p7, %s828_s28, %s203_s11  }
   0xf   : > { %p280_p10 = pnand %p676_p6, %p279_p9 }
  0x10   : > { %p325_p11 = scmp.lt.s32.totalorder (!%p280_p10), %s832_s29, 1  ;;  %s695_s21 = sshll.u32 (!%p280_p10), %s832_s29, 7 }
  0x11   : > { %283 = sbr.rel (%p280_p10) target bundleno = 300 (0x12c), region = 48  ;;  %s576_s6 = scalar_lea.hbm (!%p280_p10), %s1015_s7, %s695_s21 }
  0x12   : > { %s844_s13 = smov (!%p280_p10), [#allocation3]  }
  0x13   : > { %s768_s16 = sshll.u32 (!%p280_p10), %s844_s13, 4  ;;  %s769_s16 = int_to_ptr.vmem [resolvable:$false] %s768_s16 }
  0x16   : > { %v842_v0 = vmov 0.0   ;;  %v511_v1 = vld [vmem:[%s1012_s4] sm:$0xff]  ;;  %s326_s18 = scalar_select %p325_p11, %s832_s29, 1  ;;  %v843_v2 = vmov 0   ;;  %vm355_vm0 = vcmask 1043456   ;;  %vm351_vm1 = vcmask 31744  }
  0x17   : > { %424 = vmatprep.mubr.f32.mxu0 %v842_v0  ;;  %504 = vmatprep.mubr.f32.mxu1 %v842_v0  ;;  %v521_v3 = vld [vmem:[%s1013_s5] sm:$0xff]  ;;  %s770_s29 = scalar_lea.vmem %s769_s16, 256 }
  0x18   : > { %753 = vset.pattern.permute.xlu0 %v843_v2  ;;  %s693_s19 = sshll.u32 %s326_s18, 3  ;;  %v348_v8 = vld [vmem:[%s1011_s3] sm:$0xff]  ;;  %s541_s18 = sld [smem:[#allocation2]] }
  0x19   : > { %514 = vperm.xlu0 %753, %v511_v1   ;;  %s342_s24 = scalar_lea.vmem %s1009_s1, %s693_s19  ;;  %s332_s9 = scalar_lea.vmem %s1008_s0, %s693_s19  ;;  %v347_v9 = vld [vmem:[%s1010_s2] sm:$0xff] }
  0x1a   : > { %v957_v4 = vld [vmem:[%s342_s24] sm:$0xff]  ;;  %s321_s19 = sand.u32 1, %s824_s27  }
  0x1b   : > { %v345_v5 = vld [vmem:[%s332_s9] sm:$0xff]  ;;  %v350_v6 = vcombine.high %v957_v4, %v957_v4  ;;  %s677_s20 = sshll.u32 %s321_s19, 3  ;;  %s562_s9 = scalar_lea.sflag [#allocation4], %s321_s19 }
  0x1c   : > { %v432_v7 = vcombine.high %v345_v5, %v345_v5  ;;  %s323_s22 = scalar_lea.vmem [#allocation3], %s677_s20 }
  0x1d   : > { %524 = vperm.xlu0 %753, %v521_v3   ;;  %682 = vmatprep.subr.msk.mxu0 %vm355_vm0, %v350_v6  ;;  %s578_s23 = sshll.u32 %s323_s22, 4  ;;  %s579_s23 = int_to_ptr.vmem [resolvable:$true] %s578_s23 }
  0x1e   : > { %685 = vmatprep.subr.msk.mxu1 %vm355_vm0, %v432_v7  ;;  %683 = vmatpush1.msk.msra.mxu0 %vm355_vm0, %v957_v4  ;;  %v542_v33 = vstv %s541_s18  ;;  %s764_s11 = scalar_lea.vmem %s579_s23, 128  ;;  %p771_p1 = scmp.lt.s32.totalorder %s579_s23, %s769_s16 }
  0x1f   : > { %686 = vmatpush1.msk.msra.mxu1 %vm355_vm0, %v345_v5  ;;  %684 = vmatmul.mubr.msk.f32.vlgmr.msra.gmra.mxu0 %vm351_vm1, %v348_v8  ;;  %p765_p12 = scmp.ne.s32.totalorder %s579_s23, %s764_s11  ;;  %p772_p2 = scmp.lt.s32.totalorder %s770_s29, %s764_s11 }
  0x20   : > { %687 = vmatmul.mubr.msk.f32.vlgmr.msra.gmra.mxu1 %vm351_vm1, %v347_v9 }
  0x21   : > { %p766_p13 = pnand %p765_p12, %p928_p4  ;;  %p773_p3 = por %p772_p2, %p771_p1 }
  0x23   : > { %p767_p0 = pneg %p766_p13 }
  0x25   : > { %p774_p5 = pnand %p773_p3, %p767_p0 }
  0x94   : > { %v515_v10 = vpop.permute.xlu0 %514 }
  0x98   : > { %v525_v20 = vpop.permute.xlu0 %524 }
  0xdf   : > { %v426_v11 = vpop.f32.mrf.mxu0 }
  0xe0   : > { %v506_v12 = vpop.f32.mrf.mxu1 }
  0xe1   : > { %v507_v13 = vadd.f32 %v506_v12, %v426_v11  ;;  %v428_v14 = vpop.f32.mrf.mxu0 }
  0xe2   : > { %v508_v15 = vpop.f32.mrf.mxu1 }
  0xe3   : > { %v517_v16 = vadd.f32 %v515_v10, %v507_v13  ;;  %v509_v17 = vadd.f32 %v508_v15, %v428_v14 }
  0xe5   : > { %v518_v18 = vadd.f32 %v515_v10, %v509_v17  ;;  %v519_v19 = vmax.f32 %v517_v16, 0.0 }
  0xe7   : > { %v520_v21 = vmax.f32 %v518_v18, 0.0  ;;  %v527_v22 = vmul.f32 %v525_v20, %v519_v19 }
  0xe9   : > { %v528_v23 = vmul.f32 %v525_v20, %v520_v21  ;;  %v529_v24 = vrot.slane %v527_v22, 4 }
  0xeb   : > { %v530_v25 = vadd.f32 %v529_v24, %v527_v22  ;;  %v535_v26 = vrot.slane %v528_v23, 4 }
  0xed   : > { %v531_v27 = vrot.slane %v530_v25, 2  ;;  %v536_v28 = vadd.f32 %v535_v26, %v528_v23 }
  0xef   : > { %v532_v29 = vadd.f32 %v531_v27, %v530_v25  ;;  %v537_v30 = vrot.slane %v536_v28, 2 }
  0xf1   : > { %v533_v31 = vrot.slane %v532_v29, 1  ;;  %v538_v32 = vadd.f32 %v537_v30, %v536_v28 }
  0xf3   : > { %v534_v34 = vadd.f32 %v533_v31, %v532_v29  ;;  %v539_v35 = vrot.slane %v538_v32, 1 }
  0xf5   : > { %v540_v36 = vadd.f32 %v539_v35, %v538_v32  ;;  %v543_v37 = vadd.f32 %v542_v33, %v534_v34 }
  0xf7   : > { %v544_v38 = vadd.f32 %v542_v33, %v540_v36  ;;  %v545_v39 = vsub.f32 0.0, %v543_v37 }
  0xf9   : > { %v546_v40 = vsub.f32 0.0, %v544_v38  ;;  %v547_v41 = vmul.f32 1.442695, %v545_v39 }
  0xfb   : > { %756 = vpow2.f32 %v547_v41  ;;  %v549_v42 = vmul.f32 1.442695, %v546_v40 }
  0xfd   : > { %758 = vpow2.f32 %v549_v42 }
 0x108   : > { %v757_v43 = vpop.eup %756 }
 0x109   : > { %v551_v44 = vadd.f32 1.0, %v757_v43 }
 0x10a   : > { %v759_v45 = vpop.eup %758 }
 0x10b   : > { %v552_v46 = vadd.f32 1.0, %v759_v45  ;;  %760 = vrcp.f32 %v551_v44 }
 0x10d   : > { %762 = vrcp.f32 %v552_v46 }
 0x118   : > { %v761_v47 = vpop.eup %760 }
 0x11a   : > { %v763_v48 = vpop.eup %762 }
 0x11b   : > { %v557_v49 = vcombine.low %v761_v47, %v763_v48 }
 0x11d   : > { %v559_v50 = vmul.f32 %v557_v49, %v957_v4 }
 0x11f   : > { %560 = vst [vmem:[%s323_s22] sm:$0xff] %v559_v50 }
 0x120   : > { %777 = shalt.err (!%p774_p5)
}
 0x121   : > { %s778_s17 = scalar_lea.hbm %s576_s6, 128  ;;  %s782_s20 = scalar_lea.hbm %s1015_s7, 256 }
 0x122   : > { %p779_p6 = scmp.ne.s32.totalorder %s576_s6, %s778_s17  ;;  %p783_p10 = scmp.lt.s32.totalorder %s576_s6, %s1015_s7 }
 0x123   : > { %p784_p11 = scmp.lt.s32.totalorder %s782_s20, %s778_s17 }
 0x124   : > { %p780_p7 = pnand %p779_p6, %p928_p4 }
 0x125   : > { %p785_p12 = por %p784_p11, %p783_p10 }
 0x126   : > { %p781_p9 = pneg %p780_p7 }
 0x128   : > { %p786_p13 = pnand %p785_p12, %p781_p9 }
 0x12a   : > { %789 = shalt.err (!%p786_p13)
}
 0x12b   : > { %696 = dma.vmem_to_hbm [thread:$0]  (%p928_p4), %s579_s23, 128, %s576_s6, %s562_s9  }
 0x12c PF: > { %p702_p0 = scmp.ge.s32.totalorder %s840_s8, 2  ;;  %s590_s24 = sand.u32 1, %s820_s26  }
 0x12d   : > { %s591_s25 = scalar_lea.sflag [#allocation4], %s590_s24 }
 0x12e   : > { %p699_p1 = pnand %p702_p0, %p935_p8 }
 0x130   : > { %p700_p2 = pneg %p699_p1 }
 0x132   : > { %815 = dma.done.wait (%p700_p2), %s591_s25, 128  }
 0x133   : > { %817 = vsyncadd (%p700_p2), %s591_s25, 4294967168  ;;  %s21_s8 = sadd.s32 1, %s840_s8   ;;  %s1018_s26 = smov %s824_s27 }
 0x134   : > { %p18_p3 = scmp.ge.s32.totalorder %s21_s8, 4   ;;  %s1019_s27 = smov %s828_s28 }
 0x135   : > { %s1020_s28 = smov %s941_s15  ;;  %s1021_s29 = smov %s836_s30 }
 0x136   : > { %s1022_s30 = smov %s1024_s10  ;;  %20 = sbr.rel (!%p18_p3) target bundleno = 6 (0x6), region = 86 }
 0x13b   :  { %596 = vsyncpa [#allocation4], 1 }
 0x13c   :  { %598 = vsyncpa [#allocation4 + $0x1], 1 }

</bundles_post_ra>
